<compile_context>
chip_gen: v5e
topology: v5e:2x2
jax: 0.10.0
libtpu: 0.0.40
codegen_flags: <defaults>
</compile_context>

<pallas_src>
import jax
import jax.numpy as jnp
from jax import lax
from jax.experimental import pallas as pl
from jax.experimental.pallas import tpu as pltpu

_LANE = 128


def _ann_kernel(x_ref, w1_ref, b1_ref, w2_ref, b2_ref, w3_ref, b3_ref, oT_ref):
    # x_ref: (TB, input_size) -- natural (batch, feature) layout straight from HBM.
    # All activations are kept as (features, TB): lane-dense along the batch axis.
    x = x_ref[...]
    # h1 = sigmoid(W1 @ x^T + b1): contract over x's last (feature) dim.
    h1 = lax.dot_general(
        w1_ref[...], x,
        dimension_numbers=(((1,), (1,)), ((), ())),
        preferred_element_type=jnp.float32)
    h1 = jax.nn.sigmoid(h1 + b1_ref[...])
    # h2 = sigmoid(W2 @ h1 + b2)
    h2 = jnp.dot(w2_ref[...], h1, preferred_element_type=jnp.float32)
    h2 = jax.nn.sigmoid(h2 + b2_ref[...])
    # out = W3 @ h2 + b3
    out = jnp.dot(w3_ref[...], h2, preferred_element_type=jnp.float32)
    oT_ref[...] = out + b3_ref[...]


def _pick_tb(b_kernel, tb_max):
    """Batch tile: multiple of 128 lanes, large (amortize per-step overhead),
    capped for VMEM, and >= 2 grid steps when the batch allows (v7x megacore)."""
    b_up = -(-b_kernel // _LANE) * _LANE
    tb = min(tb_max, b_up)
    if b_up >= 2 * _LANE:
        half = -(-(b_up // 2) // _LANE) * _LANE
        tb = min(tb, half)
    return max(_LANE, (tb // _LANE) * _LANE)


def ann_forward(x, params, *, tb_max=32768):
    """Forward pass of Ann.

    x: (B, input_size) float32.
    params: (w1, b1, w2, b2, w3, b3) with weights in PyTorch (out, in) layout
            and biases as (out, 1) columns.
    Returns flat (B * output_size,), matching torch's .reshape(-1).
    """
    w1, b1, w2, b2, w3, b3 = params
    B, in_size = x.shape
    out_size = w3.shape[0]

    # Tiny batches: pad up to one lane tile (a few KB, negligible).  Larger
    # ragged batches rely on Pallas partial edge blocks instead of a full pad.
    if B < _LANE:
        x_k = jnp.pad(x, ((0, _LANE - B), (0, 0)))
        Bk = _LANE
    else:
        x_k = x
        Bk = B

    TB = _pick_tb(Bk, tb_max)
    grid_b = pl.cdiv(Bk, TB)

    # Weights/biases: single full-extent blocks, constant index_map -> stay
    # resident in VMEM, not re-DMA'd per grid step.
    const2d = lambda a: pl.BlockSpec(a.shape, lambda i: (0, 0))

    w_bytes = sum(int(a.size) * 4 for a in (w1, b1, w2, b2, w3, b3))
    cost = pl.CostEstimate(
        flops=2 * Bk * (in_size * 20 + 20 * 10 + 10 * out_size),
        transcendentals=Bk * 30,
        bytes_accessed=4 * Bk * (in_size + out_size) + w_bytes,
    )

    outT = pl.pallas_call(
        _ann_kernel,
        out_shape=jax.ShapeDtypeStruct((out_size, Bk), jnp.float32),
        grid=(grid_b,),
        in_specs=[
            pl.BlockSpec((TB, in_size), lambda i: (i, 0)),   # x, batch-tiled
            const2d(w1), const2d(b1),
            const2d(w2), const2d(b2),
            const2d(w3), const2d(b3),
        ],
        out_specs=pl.BlockSpec((out_size, TB), lambda i: (0, i)),
        compiler_params=pltpu.CompilerParams(
            dimension_semantics=("parallel",),
            vmem_limit_bytes=32 << 20,
        ),
        cost_estimate=cost,
    )(x_k, w1, b1, w2, b2, w3, b3)

    # (out_size, Bk) -> drop tiny-batch pad -> (B, out_size) -> flat, matching
    # torch's row-major .reshape(-1).
    out = outT if Bk == B else outT[:, :B]
    return out.T.reshape(-1)


def init_ann_params(key, input_size, output_size):
    """Deterministic synthetic init (stands in for Ann.init_weights).

    Weights are in PyTorch nn.Linear layout (out, in); biases are (out, 1).
    """
    k1, k2, k3, k4, k5, k6 = jax.random.split(key, 6)
    w1 = jax.random.normal(k1, (20, input_size), jnp.float32) * 0.1
    b1 = jax.random.normal(k2, (20, 1), jnp.float32) * 0.1
    w2 = jax.random.normal(k3, (10, 20), jnp.float32) * 0.1
    b2 = jax.random.normal(k4, (10, 1), jnp.float32) * 0.1
    w3 = jax.random.normal(k5, (output_size, 10), jnp.float32) * 0.1
    b3 = jax.random.normal(k6, (output_size, 1), jnp.float32) * 0.1
    return (w1, b1, w2, b2, w3, b3)


def ann_reference(x, params):
    """Pure-JAX reference for correctness checking (PyTorch semantics)."""
    w1, b1, w2, b2, w3, b3 = params
    h1 = jax.nn.sigmoid(x @ w1.T + b1.T)
    h2 = jax.nn.sigmoid(h1 @ w2.T + b2.T)
    return (h2 @ w3.T + b3.T).reshape(-1)


if __name__ == "__main__":
    key = jax.random.PRNGKey(0)
    kx, kp, kx2, kx3 = jax.random.split(key, 4)

    input_size = 16
    output_size = 4
    params = init_ann_params(kp, input_size, output_size)

    # Small case (B=2): exercises the tiny-batch lane-pad path.
    batch = 2
    x = jax.random.normal(kx, (batch, input_size), jnp.float32)
    out = jax.block_until_ready(ann_forward(x, params))
    ref = ann_reference(x, params)
    assert out.shape == (batch * output_size,), out.shape
    assert jnp.allclose(out, ref, atol=1e-5, rtol=1e-5), (out, ref)

    # Non-multiple-of-128 batch: multi-step grid + partial edge block, no pad.
    batch2 = 300
    x2 = jax.random.normal(kx2, (batch2, input_size), jnp.float32)
    out2 = jax.block_until_ready(ann_forward(x2, params))
    ref2 = ann_reference(x2, params)
    assert out2.shape == (batch2 * output_size,), out2.shape
    assert jnp.allclose(out2, ref2, atol=1e-5, rtol=1e-5)

    # Larger ragged batch: >=2 parallel grid steps + dropped OOB output writes.
    batch3 = 1000
    x3 = jax.random.normal(kx3, (batch3, input_size), jnp.float32)
    out3 = jax.block_until_ready(ann_forward(x3, params))
    ref3 = ann_reference(x3, params)
    assert out3.shape == (batch3 * output_size,), out3.shape
    assert jnp.allclose(out3, ref3, atol=1e-5, rtol=1e-5)

    print("KERNEL_OK")
</pallas_src>

<mosaic_0001>
module attributes {stable_mosaic.version = 11 : i64} {
  func.func @_ann_kernel(%arg0: i32, %arg1: memref<128x16xf32, #tpu.memory_space<vmem>>, %arg2: memref<20x16xf32, #tpu.memory_space<vmem>>, %arg3: memref<20x1xf32, #tpu.memory_space<vmem>>, %arg4: memref<10x20xf32, #tpu.memory_space<vmem>>, %arg5: memref<10x1xf32, #tpu.memory_space<vmem>>, %arg6: memref<4x10xf32, #tpu.memory_space<vmem>>, %arg7: memref<4x1xf32, #tpu.memory_space<vmem>>, %arg8: memref<4x128xf32, #tpu.memory_space<vmem>>) attributes {dimension_semantics = [#tpu.dimension_semantics<parallel>], iteration_bounds = array<i64: 1>, scalar_prefetch = 0 : i64, scratch_operands = 0 : i64, tpu.core_type = #tpu.core_type<tc>, window_params = [{transform_indices = @transform_0, window_bounds = array<i64: 128, 16>}, {pipeline_mode = #tpu.pipeline_mode<synchronous>, transform_indices = @transform_1, window_bounds = array<i64: 20, 16>}, {pipeline_mode = #tpu.pipeline_mode<synchronous>, transform_indices = @transform_2, window_bounds = array<i64: 20, 1>}, {pipeline_mode = #tpu.pipeline_mode<synchronous>, transform_indices = @transform_3, window_bounds = array<i64: 10, 20>}, {pipeline_mode = #tpu.pipeline_mode<synchronous>, transform_indices = @transform_4, window_bounds = array<i64: 10, 1>}, {pipeline_mode = #tpu.pipeline_mode<synchronous>, transform_indices = @transform_5, window_bounds = array<i64: 4, 10>}, {pipeline_mode = #tpu.pipeline_mode<synchronous>, transform_indices = @transform_6, window_bounds = array<i64: 4, 1>}, {transform_indices = @transform_7, window_bounds = array<i64: 4, 128>}]} {
    %c0 = arith.constant 0 : index
    %c0_0 = arith.constant 0 : index
    %0 = vector.load %arg1[%c0, %c0_0] : memref<128x16xf32, #tpu.memory_space<vmem>>, vector<128x16xf32>
    %c0_1 = arith.constant 0 : index
    %c0_2 = arith.constant 0 : index
    %1 = vector.load %arg2[%c0_1, %c0_2] : memref<20x16xf32, #tpu.memory_space<vmem>>, vector<20x16xf32>
    %cst = arith.constant dense<0.000000e+00> : vector<20x128xf32>
    %2 = tpu.matmul %1, %0, %cst {dimension_numbers = #tpu.dot_dimension_numbers<[1], [1], [0], [0], [0, 0, 1, 0], [], []>} : vector<20x16xf32>, vector<128x16xf32>, vector<20x128xf32> -> vector<20x128xf32>
    %c0_3 = arith.constant 0 : index
    %c0_4 = arith.constant 0 : index
    %3 = vector.load %arg3[%c0_3, %c0_4] : memref<20x1xf32, #tpu.memory_space<vmem>>, vector<20x1xf32>
    %4 = vector.broadcast %3 : vector<20x1xf32> to vector<20x128xf32>
    %5 = arith.addf %2, %4 : vector<20x128xf32>
    %6 = arith.negf %5 : vector<20x128xf32>
    %7 = math.exp %6 : vector<20x128xf32>
    %cst_5 = arith.constant 1.000000e+00 : f32
    %8 = vector.broadcast %cst_5 : f32 to vector<20x128xf32>
    %9 = arith.addf %8, %7 : vector<20x128xf32>
    %10 = arith.divf %8, %9 : vector<20x128xf32>
    %c0_6 = arith.constant 0 : index
    %c0_7 = arith.constant 0 : index
    %11 = vector.load %arg4[%c0_6, %c0_7] : memref<10x20xf32, #tpu.memory_space<vmem>>, vector<10x20xf32>
    %cst_8 = arith.constant dense<0.000000e+00> : vector<10x128xf32>
    %12 = tpu.matmul %11, %10, %cst_8 {dimension_numbers = #tpu.dot_dimension_numbers<[1], [0], [0], [1], [0, 0, 1, 1], [], []>} : vector<10x20xf32>, vector<20x128xf32>, vector<10x128xf32> -> vector<10x128xf32>
    %c0_9 = arith.constant 0 : index
    %c0_10 = arith.constant 0 : index
    %13 = vector.load %arg5[%c0_9, %c0_10] : memref<10x1xf32, #tpu.memory_space<vmem>>, vector<10x1xf32>
    %14 = vector.broadcast %13 : vector<10x1xf32> to vector<10x128xf32>
    %15 = arith.addf %12, %14 : vector<10x128xf32>
    %16 = arith.negf %15 : vector<10x128xf32>
    %17 = math.exp %16 : vector<10x128xf32>
    %cst_11 = arith.constant 1.000000e+00 : f32
    %18 = vector.broadcast %cst_11 : f32 to vector<10x128xf32>
    %19 = arith.addf %18, %17 : vector<10x128xf32>
    %20 = arith.divf %18, %19 : vector<10x128xf32>
    %c0_12 = arith.constant 0 : index
    %c0_13 = arith.constant 0 : index
    %21 = vector.load %arg6[%c0_12, %c0_13] : memref<4x10xf32, #tpu.memory_space<vmem>>, vector<4x10xf32>
    %cst_14 = arith.constant dense<0.000000e+00> : vector<4x128xf32>
    %22 = tpu.matmul %21, %20, %cst_14 {dimension_numbers = #tpu.dot_dimension_numbers<[1], [0], [0], [1], [0, 0, 1, 1], [], []>} : vector<4x10xf32>, vector<10x128xf32>, vector<4x128xf32> -> vector<4x128xf32>
    %c0_15 = arith.constant 0 : index
    %c0_16 = arith.constant 0 : index
    %23 = vector.load %arg7[%c0_15, %c0_16] : memref<4x1xf32, #tpu.memory_space<vmem>>, vector<4x1xf32>
    %24 = vector.broadcast %23 : vector<4x1xf32> to vector<4x128xf32>
    %25 = arith.addf %22, %24 : vector<4x128xf32>
    %c0_17 = arith.constant 0 : index
    %c0_18 = arith.constant 0 : index
    %26 = vector.load %arg8[%c0_17, %c0_18] : memref<4x128xf32, #tpu.memory_space<vmem>>, vector<4x128xf32>
    tpu.vector_store %arg8[%c0_17, %c0_18], %25 {strides = array<i32>} : memref<4x128xf32, #tpu.memory_space<vmem>>, vector<4x128xf32>,
    return
  }
  func.func @transform_0(%arg0: i32) -> (i32, i32) {
    %c0_i32 = arith.constant 0 : i32
    %c0_i32_0 = arith.constant 0 : i32
    return %arg0, %c0_i32 : i32, i32
  }
  func.func @transform_1(%arg0: i32) -> (i32, i32) {
    %c0_i32 = arith.constant 0 : i32
    %c0_i32_0 = arith.constant 0 : i32
    %c0_i32_1 = arith.constant 0 : i32
    return %c0_i32, %c0_i32_0 : i32, i32
  }
  func.func @transform_2(%arg0: i32) -> (i32, i32) {
    %c0_i32 = arith.constant 0 : i32
    %c0_i32_0 = arith.constant 0 : i32
    %c0_i32_1 = arith.constant 0 : i32
    return %c0_i32, %c0_i32_0 : i32, i32
  }
  func.func @transform_3(%arg0: i32) -> (i32, i32) {
    %c0_i32 = arith.constant 0 : i32
    %c0_i32_0 = arith.constant 0 : i32
    %c0_i32_1 = arith.constant 0 : i32
    return %c0_i32, %c0_i32_0 : i32, i32
  }
  func.func @transform_4(%arg0: i32) -> (i32, i32) {
    %c0_i32 = arith.constant 0 : i32
    %c0_i32_0 = arith.constant 0 : i32
    %c0_i32_1 = arith.constant 0 : i32
    return %c0_i32, %c0_i32_0 : i32, i32
  }
  func.func @transform_5(%arg0: i32) -> (i32, i32) {
    %c0_i32 = arith.constant 0 : i32
    %c0_i32_0 = arith.constant 0 : i32
    %c0_i32_1 = arith.constant 0 : i32
    return %c0_i32, %c0_i32_0 : i32, i32
  }
  func.func @transform_6(%arg0: i32) -> (i32, i32) {
    %c0_i32 = arith.constant 0 : i32
    %c0_i32_0 = arith.constant 0 : i32
    %c0_i32_1 = arith.constant 0 : i32
    return %c0_i32, %c0_i32_0 : i32, i32
  }
  func.func @transform_7(%arg0: i32) -> (i32, i32) {
    %c0_i32 = arith.constant 0 : i32
    %c0_i32_0 = arith.constant 0 : i32
    return %c0_i32, %arg0 : i32, i32
  }
}

</mosaic_0001>

<bundles_post_ra>
// kernel: tpu_custom_call.1
= control target key start
LH: loop header
LB: loop body
LE: loop exit
PB: predicated region body
PF: predicated region fallthrough
CT: control target
= control target key end

     0   :  { %vm64_vm0 = vcmask 130048   ;;  %s615_s0 = inlined_call_operand.vmem [shape: f32[128,16], index: 0, kind: input, shape index: {}]   ;;  %s616_s1 = inlined_call_operand.vmem [shape: f32[20,16], index: 1, kind: input, shape index: {}]   ;;  %s617_s2 = inlined_call_operand.vmem [shape: f32[20,1], index: 2, kind: input, shape index: {}]   ;;  %s618_s3 = inlined_call_operand.vmem [shape: f32[10,20], index: 3, kind: input, shape index: {}]   ;;  %s619_s4 = inlined_call_operand.vmem [shape: f32[10,1], index: 4, kind: input, shape index: {}]   ;;  %s620_s5 = inlined_call_operand.vmem [shape: f32[4,10], index: 5, kind: input, shape index: {}]   ;;  %s621_s6 = inlined_call_operand.vmem [shape: f32[4,1], index: 6, kind: input, shape index: {}]   ;;  %s622_s7 = inlined_call_operand.hbm [shape: f32[4,128], index: 7, kind: output, shape index: {}]  }
   0x1   :  { %v42_v0 = vld [vmem:[%s615_s0 + $0x78] sm:$0xff]  ;;  %v41_v1 = vld [vmem:[%s615_s0 + $0x70] sm:$0xff] }
   0x2   :  { %372 = vmatpush.xpose.msk.msra.mxu3 %vm64_vm0, %v42_v0  ;;  %343 = vmatpush.xpose.msk.msra.mxu0 %vm64_vm0, %v42_v0 }
   0x3   :  { %12 = vsyncpa [#allocation3], 0  ;;  %v40_v2 = vld [vmem:[%s615_s0 + $0x68] sm:$0xff]  ;;  %v39_v3 = vld [vmem:[%s615_s0 + $0x60] sm:$0xff]  ;;  %v439_v10 = vmov 0   ;;  %vm226_vm10 = vcmask 1043456  }
   0x4   :  { %v38_v4 = vld [vmem:[%s615_s0 + $0x58] sm:$0xff]  ;;  %v37_v5 = vld [vmem:[%s615_s0 + $0x50] sm:$0xff]  ;;  %v36_v6 = vld [vmem:[%s615_s0 + $0x48] sm:$0xff]  ;;  %390 = vset.pattern.permute.xlu0 %v439_v10  ;;  %391 = vset.pattern.permute.xlu1 %v439_v10  ;;  %vm219_vm14 = vcmask 162816   ;;  %s440_s28 = smov [#allocation2]   ;;  %s334_s9 = sshll.u32 %s622_s7, 4  ;;  %s335_s9 = int_to_ptr.hbm [resolvable:$true] %s334_s9 }
   0x5   :  { %v35_v7 = vld [vmem:[%s615_s0 + $0x40] sm:$0xff]  ;;  %v34_v8 = vld [vmem:[%s615_s0 + $0x38] sm:$0xff]  ;;  %v33_v9 = vld [vmem:[%s615_s0 + $0x30] sm:$0xff]  ;;  %392 = vset.pattern.permute.xlu2 %v439_v10  ;;  %s332_s29 = sshll.u32 %s440_s28, 4  ;;  %s333_s29 = int_to_ptr.vmem [resolvable:$true] %s332_s29 }
   0x6   :  { %373 = vmatpush.xpose.msk.msra.mxu3 %vm64_vm0, %v41_v1  ;;  %344 = vmatpush.xpose.msk.msra.mxu0 %vm64_vm0, %v41_v1  ;;  %v32_v11 = vld [vmem:[%s615_s0 + $0x28] sm:$0xff]  ;;  %v48_v12 = vld [vmem:[%s617_s2 + $0x10] sm:$0xf]  ;;  %v46_v13 = vld [vmem:[%s617_s2] sm:$0xff] }
   0x7   :  { %v31_v14 = vld [vmem:[%s615_s0 + $0x20] sm:$0xff]  ;;  %61 = vperm.xlu0 %390, %v48_v12   ;;  %51 = vperm.xlu1 %391, %v46_v13   ;;  %v30_v15 = vld [vmem:[%s615_s0 + $0x18] sm:$0xff]  ;;  %v47_v16 = vld [vmem:[%s617_s2 + $0x8] sm:$0xff] }
   0x8   :  { %v208_v17 = vld [vmem:[%s619_s4 + $0x8] sm:$0x3]  ;;  %v29_v18 = vld [vmem:[%s615_s0 + $0x10] sm:$0xff]  ;;  %v27_v20 = vld [vmem:[%s615_s0] sm:$0xff] }
   0x9   :  { %v28_v19 = vld [vmem:[%s615_s0 + $0x8] sm:$0xff]  ;;  %v43_v22 = vld [vmem:[%s616_s1] sm:$0xff]  ;;  %v45_v23 = vld [vmem:[%s616_s1 + $0x10] sm:$0xf] }
   0xa   :  { %374 = vmatpush.xpose.msk.msra.mxu3 %vm64_vm0, %v40_v2  ;;  %345 = vmatpush.xpose.msk.msra.mxu0 %vm64_vm0, %v40_v2  ;;  %v44_v21 = vld [vmem:[%s616_s1 + $0x8] sm:$0xff]  ;;  %v207_v44 = vld [vmem:[%s619_s4] sm:$0xff] }
   0xb   :  { %211 = vperm.xlu2 %392, %v207_v44   ;;  %v292_v48 = vld [vmem:[%s621_s6] sm:$0xf]  ;;  %v206_v13 = vld [vmem:[%s618_s3 + $0x8] sm:$0x3] }
   0xe   :  { %375 = vmatpush.xpose.msk.msra.mxu3 %vm64_vm0, %v39_v3  ;;  %346 = vmatpush.xpose.msk.msra.mxu0 %vm64_vm0, %v39_v3 }
   0xf   :  { %56 = vperm.xlu0 %390, %v47_v16   ;;  %216 = vperm.xlu1 %391, %v208_v17  }
  0x12   :  { %376 = vmatpush.xpose.msk.msra.mxu3 %vm64_vm0, %v38_v4  ;;  %347 = vmatpush.xpose.msk.msra.mxu0 %vm64_vm0, %v38_v4 }
  0x13   :  { %295 = vperm.xlu2 %392, %v292_v48  }
  0x16   :  { %377 = vmatpush.xpose.msk.msra.mxu3 %vm64_vm0, %v37_v5  ;;  %348 = vmatpush.xpose.msk.msra.mxu0 %vm64_vm0, %v37_v5 }
  0x1a   :  { %378 = vmatpush.xpose.msk.msra.mxu3 %vm64_vm0, %v36_v6  ;;  %349 = vmatpush.xpose.msk.msra.mxu0 %vm64_vm0, %v36_v6 }
  0x1e   :  { %379 = vmatpush.xpose.msk.msra.mxu3 %vm64_vm0, %v35_v7  ;;  %350 = vmatpush.xpose.msk.msra.mxu0 %vm64_vm0, %v35_v7 }
  0x22   :  { %380 = vmatpush.xpose.msk.msra.mxu3 %vm64_vm0, %v34_v8  ;;  %351 = vmatpush.xpose.msk.msra.mxu0 %vm64_vm0, %v34_v8 }
  0x26   :  { %381 = vmatpush.xpose.msk.msra.mxu3 %vm64_vm0, %v33_v9  ;;  %352 = vmatpush.xpose.msk.msra.mxu0 %vm64_vm0, %v33_v9 }
  0x2a   :  { %382 = vmatpush.xpose.msk.msra.mxu3 %vm64_vm0, %v32_v11  ;;  %353 = vmatpush.xpose.msk.msra.mxu0 %vm64_vm0, %v32_v11  ;;  %v205_v11 = vld [vmem:[%s618_s3] sm:$0xff] }
  0x2e   :  { %383 = vmatpush.xpose.msk.msra.mxu3 %vm64_vm0, %v31_v14  ;;  %354 = vmatpush.xpose.msk.msra.mxu0 %vm64_vm0, %v31_v14 }
  0x32   :  { %384 = vmatpush.xpose.msk.msra.mxu3 %vm64_vm0, %v30_v15  ;;  %355 = vmatpush.xpose.msk.msra.mxu0 %vm64_vm0, %v30_v15 }
  0x36   :  { %385 = vmatpush.xpose.msk.msra.mxu3 %vm64_vm0, %v29_v18  ;;  %356 = vmatpush.xpose.msk.msra.mxu0 %vm64_vm0, %v29_v18 }
  0x3a   :  { %386 = vmatpush.xpose.msk.msra.mxu3 %vm64_vm0, %v28_v19  ;;  %357 = vmatpush.xpose.msk.msra.mxu0 %vm64_vm0, %v28_v19 }
  0x3e   :  { %387 = vmatpush.xpose.msk.msra.mxu3 %vm64_vm0, %v27_v20  ;;  %358 = vmatpush.xpose.msk.msra.mxu0 %vm64_vm0, %v27_v20 }
  0x41   :  { %360 = vmatmul.msk.f32.vlgmr.msra.gmra.mxu3 %vm64_vm0, %v44_v21  ;;  %359 = vmatmul.msk.f32.vlgmr.msra.gmra.mxu0 %vm64_vm0, %v43_v22 }
  0x49   :  { %361 = vmatmul.msk.f32.gmra.mxu3 %vm64_vm0, %v45_v23 }
  0x65   :  { %v212_v14 = vpop.permute.xlu2 %211 }
  0x79   :  { %v62_v24 = vpop.permute.xlu0 %61  ;;  %v52_v25 = vpop.permute.xlu1 %51 }
  0x81   :  { %v57_v29 = vpop.permute.xlu0 %56  ;;  %v217_v18 = vpop.permute.xlu1 %216 }
  0xbe   :  { %v139_v26 = vpop.f32.mrf.mxu0 }
  0xbf   :  { %v140_v27 = vadd.f32 %v139_v26, %v52_v25 }
  0xc1   :  { %v362_v28 = vmul.f32 -1.442695, %v140_v27 }
  0xc3   :  { %393 = vpow2.f32 %v362_v28 }
  0xc4   :  { %v142_v30 = vpop.f32.mrf.mxu3 }
  0xc5   :  { %v143_v31 = vadd.f32 %v142_v30, %v57_v29 }
  0xc7   :  { %v363_v32 = vmul.f32 -1.442695, %v143_v31 }
  0xc9   :  { %v394_v33 = vpop.eup %393  ;;  %395 = vpow2.f32 %v363_v32 }
  0xca   :  { %v157_v34 = vadd.f32 1.0, %v394_v33 }
  0xcc   :  { %v145_v35 = vpop.f32.mrf.mxu3  ;;  %397 = vrcp.f32 %v157_v34  ;;  %vm165_vm1 = vweird.f32 %v157_v34  ;;  %v169_v61 = vand.u32 2147483647, %v157_v34  ;;  %v171_v62 = vand.u32 2147483648, %v157_v34 }
  0xcd   :  { %v146_v36 = vadd.f32 %v145_v35, %v62_v24 }
  0xce   :  { %v172_v8 = vor.u32 1.1754944e-38, %v171_v62  ;;  %vm170_vm13 = vcmp.eq.f32.partialorder %v169_v61, 8.507059e+37 }
  0xcf   :  { %v396_v37 = vpop.eup %395  ;;  %v364_v38 = vmul.f32 -1.442695, %v146_v36 }
  0xd0   :  { %v158_v39 = vadd.f32 1.0, %v396_v37 }
  0xd1   :  { %399 = vpow2.f32 %v364_v38 }
  0xd2   :  { %401 = vrcp.f32 %v158_v39  ;;  %v398_v40 = vpop.eup %397  ;;  %vm180_vm5 = vweird.f32 %v158_v39  ;;  %v186_v59 = vand.u32 2147483648, %v158_v39  ;;  %v184_v1 = vand.u32 2147483647, %v158_v39 }
  0xd3   :  { %v161_v46 = vmul.f32 %v398_v40, %v157_v34  ;;  %vm166_vm2 = vweird.f32 %v398_v40 }
  0xd4   :  { %vm591_vm6 = vmor %vm165_vm1, %vm166_vm2  ;;  %v187_v7 = vor.u32 1.1754944e-38, %v186_v59  ;;  %vm185_vm12 = vcmp.eq.f32.partialorder %v184_v1, 8.507059e+37 }
  0xd5   :  { %v162_v49 = vsub.f32 1.0, %v161_v46 }
  0xd7   :  { %v400_v41 = vpop.eup %399  ;;  %v163_v54 = vmul.f32 %v398_v40, %v162_v49 }
  0xd8   :  { %v402_v42 = vpop.eup %401  ;;  %v159_v43 = vadd.f32 1.0, %v400_v41 }
  0xd9   :  { %v176_v45 = vmul.f32 %v402_v42, %v158_v39  ;;  %vm181_vm3 = vweird.f32 %v402_v42  ;;  %v164_v2 = vadd.f32 %v398_v40, %v163_v54 }
  0xda   :  { %403 = vrcp.f32 %v159_v43  ;;  %v201_v55 = vand.u32 2147483648, %v159_v43  ;;  %v199_v57 = vand.u32 2147483647, %v159_v43  ;;  %vm195_vm7 = vweird.f32 %v159_v43  ;;  %vm595_vm8 = vmor %vm180_vm5, %vm181_vm3 }
  0xdb   :  { %v177_v47 = vsub.f32 1.0, %v176_v45  ;;  %v168_v9 = vsel %vm591_vm6, %v398_v40, %v164_v2  ;;  %vm302_vm5 = vcmask 1041408   ;;  %v291_v45 = vld [vmem:[%s620_s5] sm:$0xf] }
  0xdc   :  { %v202_v3 = vor.u32 1.1754944e-38, %v201_v55  ;;  %vm200_vm11 = vcmp.eq.f32.partialorder %v199_v57, 8.507059e+37  ;;  %v173_v12 = vsel %vm170_vm13, %v172_v8, %v168_v9 }
  0xdd   :  { %v178_v52 = vmul.f32 %v402_v42, %v177_v47  ;;  %v296_v47 = vpop.permute.xlu2 %295 }
  0xdf   :  { %v179_v58 = vadd.f32 %v402_v42, %v178_v52 }
  0xe0   :  { %v404_v50 = vpop.eup %403 }
  0xe1   :  { %v191_v51 = vmul.f32 %v404_v50, %v159_v43  ;;  %vm196_vm4 = vweird.f32 %v404_v50  ;;  %v183_v5 = vsel %vm595_vm8, %v402_v42, %v179_v58  ;;  %vm298_vm8 = vcmask 80896  }
  0xe2   :  { %vm197_vm9 = vmor %vm195_vm7, %vm196_vm4  ;;  %v188_v10 = vsel %vm185_vm12, %v187_v7, %v183_v5 }
  0xe3   :  { %v192_v53 = vsub.f32 1.0, %v191_v51 }
  0xe5   :  { %v193_v56 = vmul.f32 %v404_v50, %v192_v53 }
  0xe7   :  { %v194_v63 = vadd.f32 %v404_v50, %v193_v56 }
  0xe9   :  { %v198_v4 = vsel %vm197_vm9, %v404_v50, %v194_v63 }
  0xea   :  { %v203_v6 = vsel %vm200_vm11, %v202_v3, %v198_v4 }
  0xeb   :  { %365 = vmatpush.msk.msra.mxu1 %vm226_vm10, %v203_v6 }
  0xed   :  { %244 = vmatpush.msra.mxu1 %v188_v10 }
  0xef   :  { %245 = vmatpush.msra.mxu1 %v173_v12 }
  0xf0   :  { %366 = vmatmul.msk.f32.vlgmr.msra.gmra.mxu1 %vm219_vm14, %v205_v11 }
  0xf8   :  { %367 = vmatmul.msk.f32.gmra.mxu1 %vm219_vm14, %v206_v13 }
 0x16d   :  { %v247_v15 = vpop.f32.mrf.mxu1 }
 0x16e   :  { %v248_v16 = vadd.f32 %v247_v15, %v212_v14 }
 0x170   :  { %v368_v17 = vmul.f32 -1.442695, %v248_v16 }
 0x172   :  { %405 = vpow2.f32 %v368_v17 }
 0x175   :  { %v250_v19 = vpop.f32.mrf.mxu1 }
 0x176   :  { %v251_v20 = vadd.f32 %v250_v19, %v217_v18 }
 0x178   :  { %v406_v21 = vpop.eup %405  ;;  %v369_v22 = vmul.f32 -1.442695, %v251_v20 }
 0x179   :  { %v259_v23 = vadd.f32 1.0, %v406_v21 }
 0x17a   :  { %407 = vpow2.f32 %v369_v22 }
 0x17b   :  { %409 = vrcp.f32 %v259_v23  ;;  %vm266_vm1 = vweird.f32 %v259_v23  ;;  %v272_v37 = vand.u32 2147483648, %v259_v23  ;;  %v270_v39 = vand.u32 2147483647, %v259_v23 }
 0x17d   :  { %v273_v44 = vor.u32 1.1754944e-38, %v272_v37  ;;  %vm271_vm7 = vcmp.eq.f32.partialorder %v270_v39, 8.507059e+37 }
 0x180   :  { %v408_v24 = vpop.eup %407 }
 0x181   :  { %v410_v25 = vpop.eup %409  ;;  %v260_v26 = vadd.f32 1.0, %v408_v24 }
 0x182   :  { %v262_v27 = vmul.f32 %v410_v25, %v259_v23  ;;  %vm267_vm15 = vweird.f32 %v410_v25 }
 0x183   :  { %411 = vrcp.f32 %v260_v26  ;;  %v287_v33 = vand.u32 2147483648, %v260_v26  ;;  %v285_v35 = vand.u32 2147483647, %v260_v26  ;;  %vm281_vm2 = vweird.f32 %v260_v26  ;;  %vm268_vm3 = vmor %vm266_vm1, %vm267_vm15 }
 0x184   :  { %v263_v28 = vsub.f32 1.0, %v262_v27 }
 0x185   :  { %v288_v40 = vor.u32 1.1754944e-38, %v287_v33  ;;  %vm286_vm6 = vcmp.eq.f32.partialorder %v285_v35, 8.507059e+37 }
 0x186   :  { %v264_v31 = vmul.f32 %v410_v25, %v263_v28 }
 0x188   :  { %v265_v36 = vadd.f32 %v410_v25, %v264_v31 }
 0x189   :  { %v412_v29 = vpop.eup %411 }
 0x18a   :  { %v277_v30 = vmul.f32 %v412_v29, %v260_v26  ;;  %vm282_vm0 = vweird.f32 %v412_v29  ;;  %v269_v42 = vsel %vm268_vm3, %v410_v25, %v265_v36 }
 0x18b   :  { %vm283_vm4 = vmor %vm281_vm2, %vm282_vm0  ;;  %v274_v46 = vsel %vm271_vm7, %v273_v44, %v269_v42 }
 0x18c   :  { %v278_v32 = vsub.f32 1.0, %v277_v30 }
 0x18e   :  { %v279_v34 = vmul.f32 %v412_v29, %v278_v32 }
 0x190   :  { %v280_v38 = vadd.f32 %v412_v29, %v279_v34 }
 0x192   :  { %v284_v41 = vsel %vm283_vm4, %v412_v29, %v280_v38 }
 0x193   :  { %v289_v43 = vsel %vm286_vm6, %v288_v40, %v284_v41 }
 0x194   :  { %370 = vmatpush.msk.msra.mxu2 %vm302_vm5, %v289_v43 }
 0x196   :  { %321 = vmatpush.msra.mxu2 %v274_v46 }
 0x197   :  { %371 = vmatmul.msk.f32.vlgmr.msra.gmra.mxu2 %vm298_vm8, %v291_v45 }
 0x21a   :  { %v323_v48 = vpop.f32.mrf.mxu2 }
 0x21b   :  { %v324_v49 = vadd.f32 %v323_v48, %v296_v47 }
 0x21d   :  { %326 = vst [vmem:[#allocation2] sm:$0xf] %v324_v49 }
 0x21e   :  { %337 = dma.vmem_to_hbm [thread:$0]  %s333_s29, 64, %s335_s9, [#allocation3]  }
 0x21f   :  { %437 = dma.done.wait [#allocation3], 64  }
 0x220   :  { %438 = vsyncadd [#allocation3], 4294967232 }
 0x221   :  { %342 = vsyncpa [#allocation3], 1 }

</bundles_post_ra>
